<compile_context>
chip_gen: v6e
topology: v6e:2x2x1
jax: 0.10.0
libtpu: 0.0.40
codegen_flags: <defaults>
</compile_context>

<pallas_src>
import functools

import jax
import jax.numpy as jnp
from jax.experimental import pallas as pl
from jax.experimental.pallas import tpu as pltpu


def _matchshifted_kernel(left_ref, right_ref, o_ref, *, shift, width):
    # left_ref / right_ref: (1, TILE_C, TILE_HW)   with TILE_HW a multiple of W
    # o_ref:                (1, 2, TILE_C, TILE_HW)
    #   [.., 0, ..] = shifted_left, [.., 1, ..] = shifted_right
    l = left_ref[0]                                   # (TILE_C, TILE_HW)
    r = right_ref[0]                                  # (TILE_C, TILE_HW)
    tile_hw = l.shape[-1]

    # In-kernel mask: column index (w) of every flattened position.  TILE_HW
    # is a whole number of rows, so iota % W is the true column in any tile.
    col = jax.lax.broadcasted_iota(jnp.int32, (1, tile_hw), 1) % width
    keep = col >= shift                               # (1, TILE_HW), broadcasts over C
    zero = jnp.zeros_like(l)

    # Left half: zero the first `shift` columns of every row.
    o_ref[0, 0] = jnp.where(keep, l, zero)

    # Right half: shift every row right by `shift`.  Rolling the flattened,
    # row-aligned HW axis is exact because any wrapped element lands only in
    # the masked (w < shift) region.
    if shift > 0:
        r = pltpu.roll(r, shift, axis=1)
    o_ref[0, 1] = jnp.where(keep, r, zero)


def _choose_tiles(b, c, h, w, itemsize, *,
                  block_budget=4 << 20,     # ~4 MiB per input block (v7x-friendly)
                  min_grid_steps=8,         # keep both v7x TensorCores fed
                  min_block=256 << 10):     # don't shrink below ~256 KiB blocks
    """Pick (tile_c, tile_rows): channel tile + row-aligned HW tile."""
    hw = h * w
    pack = {4: 8, 2: 16, 1: 32}.get(itemsize, 8)      # sublane pack per dtype

    # 1) Shrink the channel tile while the block is over budget and the
    #    halved tile stays a clean multiple of the dtype sublane pack.
    tile_c = c
    while tile_c * hw * itemsize > block_budget and tile_c % (2 * pack) == 0:
        tile_c //= 2

    # 2) Row-aligned HW fallback (small-C / huge-HW).  Tiles must be a whole
    #    number of rows (roll correctness) and, if tiled at all, a multiple of
    #    128 lanes (unmasked lane-dense stores / (8,128) block constraint).
    tile_rows = h
    if tile_c * hw * itemsize > block_budget:
        candidates = [r for r in range(1, h) if h % r == 0
                      and (r * w) % 128 == 0
                      and tile_c * r * w * itemsize <= block_budget]
        if candidates:
            tile_rows = max(candidates)
        # else: keep full HW (no legal lane-dense tiling); vmem limit below
        # is still set explicitly with headroom.

    # 3) Make sure the grid has enough steps for megacore / v7x 2-TC sharding,
    #    without shrinking blocks into per-step-overhead territory.
    def steps(tc, tr):
        return b * (c // tc) * (h // tr)

    while (steps(tile_c, tile_rows) < min_grid_steps
           and tile_c % (2 * pack) == 0
           and (tile_c // 2) * tile_rows * w * itemsize >= min_block):
        tile_c //= 2

    return tile_c, tile_rows


def matchshifted(left, right, shift):
    """left, right: (B, C, H, W); shift: static Python int. Returns (B, 2C, 1, H, W)."""
    assert left.shape == right.shape and left.dtype == right.dtype
    b, c, h, w = left.shape
    shift = int(shift)
    if not 0 <= shift < w:
        raise ValueError(f"shift must be in [0, width); got shift={shift}, width={w}")

    hw = h * w
    itemsize = jnp.dtype(left.dtype).itemsize

    tile_c, tile_rows = _choose_tiles(b, c, h, w, itemsize)
    tile_hw = tile_rows * w
    assert c % tile_c == 0 and h % tile_rows == 0

    left_f = left.reshape(b, c, hw)
    right_f = right.reshape(b, c, hw)

    # VMEM budget: 2 inputs + 1 output (2x an input block), all double-
    # buffered, plus slack.  Clamped so it fits every generation (v7x: 64 MiB).
    in_block = tile_c * tile_hw * itemsize
    vmem_bytes = int(min(max(16 << 20, 8 * in_block + (4 << 20)), 48 << 20))

    grid = (b, c // tile_c, h // tile_rows)

    out = pl.pallas_call(
        functools.partial(_matchshifted_kernel, shift=shift, width=w),
        out_shape=jax.ShapeDtypeStruct((b, 2, c, hw), left.dtype),
        grid_spec=pltpu.PrefetchScalarGridSpec(
            num_scalar_prefetch=0,
            grid=grid,
            in_specs=[
                pl.BlockSpec((1, tile_c, tile_hw), lambda ib, ic, ih: (ib, ic, ih)),
                pl.BlockSpec((1, tile_c, tile_hw), lambda ib, ic, ih: (ib, ic, ih)),
            ],
            out_specs=pl.BlockSpec((1, 2, tile_c, tile_hw),
                                   lambda ib, ic, ih: (ib, 0, ic, ih)),
        ),
        compiler_params=pltpu.CompilerParams(
            dimension_semantics=("parallel", "parallel", "parallel"),
            vmem_limit_bytes=vmem_bytes,
        ),
    )(left_f, right_f)

    # (B, 2, C, HW) -> (B, 2C, 1, H, W); channels [0:C] = left, [C:2C] = right,
    # matching torch.cat((shifted_left, shifted_right), dim=1).
    return out.reshape(b, 2 * c, 1, h, w)


def matchshifted_ref(left, right, shift):
    """Pure-JAX reference matching the PyTorch forward."""
    b, c, h, w = left.shape
    sl = jnp.pad(left[..., shift:], ((0, 0), (0, 0), (0, 0), (shift, 0)))
    sr = jnp.pad(right[..., : w - shift], ((0, 0), (0, 0), (0, 0), (shift, 0)))
    return jnp.concatenate([sl, sr], axis=1).reshape(b, 2 * c, 1, h, w)


if __name__ == "__main__":
    key = jax.random.PRNGKey(0)
    k1, k2, k3, k4 = jax.random.split(key, 4)

    # Primary case (matches the module's intended small shapes).
    B, C, H, W = 2, 4, 16, 16
    shift = 3
    left = jax.random.normal(k1, (B, C, H, W), dtype=jnp.float32)
    right = jax.random.normal(k2, (B, C, H, W), dtype=jnp.float32)

    out = jax.block_until_ready(matchshifted(left, right, shift))
    ref = matchshifted_ref(left, right, shift)
    assert out.shape == (B, 2 * C, 1, H, W)
    assert out.dtype == left.dtype
    assert jnp.array_equal(out, ref)          # pure data movement -> exact match

    # Secondary case: bf16 + wider W, exercises the dtype-aware tile policy.
    B2, C2, H2, W2, shift2 = 1, 16, 8, 128, 5
    left2 = jax.random.normal(k3, (B2, C2, H2, W2), dtype=jnp.bfloat16)
    right2 = jax.random.normal(k4, (B2, C2, H2, W2), dtype=jnp.bfloat16)
    out2 = jax.block_until_ready(matchshifted(left2, right2, shift2))
    assert jnp.array_equal(out2, matchshifted_ref(left2, right2, shift2))

    print("KERNEL_OK")
</pallas_src>

<mosaic_0001>
module attributes {stable_mosaic.version = 11 : i64} {
  func.func @_matchshifted_kernel(%arg0: i32, %arg1: i32, %arg2: i32, %arg3: memref<1x4x256xf32, #tpu.memory_space<vmem>>, %arg4: memref<1x4x256xf32, #tpu.memory_space<vmem>>, %arg5: memref<1x2x4x256xf32, #tpu.memory_space<vmem>>) attributes {dimension_semantics = [#tpu.dimension_semantics<parallel>, #tpu.dimension_semantics<parallel>, #tpu.dimension_semantics<parallel>], iteration_bounds = array<i64: 2, 1, 1>, scalar_prefetch = 0 : i64, scratch_operands = 0 : i64, tpu.core_type = #tpu.core_type<tc>, window_params = [{transform_indices = @transform_0, window_bounds = array<i64: 1, 4, 256>}, {transform_indices = @transform_1, window_bounds = array<i64: 1, 4, 256>}, {transform_indices = @transform_2, window_bounds = array<i64: 1, 2, 4, 256>}]} {
    %c0 = arith.constant 0 : index
    %c0_0 = arith.constant 0 : index
    %c0_1 = arith.constant 0 : index
    %0 = vector.load %arg3[%c0, %c0_0, %c0_1] : memref<1x4x256xf32, #tpu.memory_space<vmem>>, vector<1x4x256xf32>
    %1 = vector.shape_cast %0 : vector<1x4x256xf32> to vector<4x256xf32>
    %c0_2 = arith.constant 0 : index
    %c0_3 = arith.constant 0 : index
    %c0_4 = arith.constant 0 : index
    %2 = vector.load %arg4[%c0_2, %c0_3, %c0_4] : memref<1x4x256xf32, #tpu.memory_space<vmem>>, vector<1x4x256xf32>
    %3 = vector.shape_cast %2 : vector<1x4x256xf32> to vector<4x256xf32>
    %4 = tpu.iota {dimensions = array<i32: 1>} : vector<1x256xi32>
    %c16_i32 = arith.constant 16 : i32
    %c0_i32 = arith.constant 0 : i32
    %5 = arith.cmpi eq, %c16_i32, %c0_i32 : i32
    %c1_i32 = arith.constant 1 : i32
    %6 = arith.select %5, %c1_i32, %c16_i32 : i32
    %7 = vector.broadcast %6 : i32 to vector<1x256xi32>
    %8 = arith.remsi %4, %7 : vector<1x256xi32>
    %c0_i32_5 = arith.constant 0 : i32
    %9 = vector.broadcast %c0_i32_5 : i32 to vector<1x256xi32>
    %10 = arith.cmpi ne, %8, %9 : vector<1x256xi32>
    %c0_i32_6 = arith.constant 0 : i32
    %11 = vector.broadcast %c0_i32_6 : i32 to vector<1x256xi32>
    %12 = arith.cmpi slt, %8, %11 : vector<1x256xi32>
    %c0_i32_7 = arith.constant 0 : i32
    %13 = arith.cmpi slt, %6, %c0_i32_7 : i32
    %14 = vector.broadcast %13 : i1 to vector<1x256xi1>
    %15 = vector.broadcast %14 : vector<1x256xi1> to vector<1x256xi1>
    %16 = arith.xori %12, %15 : vector<1x256xi1>
    %17 = arith.andi %16, %10 : vector<1x256xi1>
    %18 = vector.broadcast %6 : i32 to vector<1x256xi32>
    %19 = arith.addi %8, %18 : vector<1x256xi32>
    %20 = arith.select %17, %19, %8 : vector<1x256xi1>, vector<1x256xi32>
    %c3_i32 = arith.constant 3 : i32
    %21 = vector.broadcast %c3_i32 : i32 to vector<1x256xi32>
    %22 = arith.cmpi sge, %20, %21 : vector<1x256xi32>
    %cst = arith.constant 0.000000e+00 : f32
    %23 = vector.broadcast %cst : f32 to vector<4x256xf32>
    %24 = vector.shape_cast %22 : vector<1x256xi1> to vector<1x256xi1>
    %25 = vector.broadcast %24 : vector<1x256xi1> to vector<4x256xi1>
    %26 = arith.select %25, %1, %23 : vector<4x256xi1>, vector<4x256xf32>
    %c0_8 = arith.constant 0 : index
    %c0_9 = arith.constant 0 : index
    %c0_10 = arith.constant 0 : index
    %c0_11 = arith.constant 0 : index
    %27 = vector.load %arg5[%c0_8, %c0_9, %c0_10, %c0_11] : memref<1x2x4x256xf32, #tpu.memory_space<vmem>>, vector<1x1x4x256xf32>
    %28 = vector.shape_cast %27 : vector<1x1x4x256xf32> to vector<4x256xf32>
    %29 = vector.shape_cast %26 : vector<4x256xf32> to vector<1x1x4x256xf32>
    tpu.vector_store %arg5[%c0_8, %c0_9, %c0_10, %c0_11], %29 {strides = array<i32>} : memref<1x2x4x256xf32, #tpu.memory_space<vmem>>, vector<1x1x4x256xf32>,
    %c3_i32_12 = arith.constant 3 : i32
    %30 = tpu.dynamic_rotate %3 by %c3_i32_12 dim 1 : vector<4x256xf32>, i32 -> vector<4x256xf32>
    %31 = vector.shape_cast %22 : vector<1x256xi1> to vector<1x256xi1>
    %32 = vector.broadcast %31 : vector<1x256xi1> to vector<4x256xi1>
    %33 = arith.select %32, %30, %23 : vector<4x256xi1>, vector<4x256xf32>
    %c0_13 = arith.constant 0 : index
    %c1 = arith.constant 1 : index
    %c0_14 = arith.constant 0 : index
    %c0_15 = arith.constant 0 : index
    %34 = vector.load %arg5[%c0_13, %c1, %c0_14, %c0_15] : memref<1x2x4x256xf32, #tpu.memory_space<vmem>>, vector<1x1x4x256xf32>
    %35 = vector.shape_cast %34 : vector<1x1x4x256xf32> to vector<4x256xf32>
    %36 = vector.shape_cast %33 : vector<4x256xf32> to vector<1x1x4x256xf32>
    tpu.vector_store %arg5[%c0_13, %c1, %c0_14, %c0_15], %36 {strides = array<i32>} : memref<1x2x4x256xf32, #tpu.memory_space<vmem>>, vector<1x1x4x256xf32>,
    return
  }
  func.func @transform_0(%arg0: i32, %arg1: i32, %arg2: i32) -> (i32, i32, i32) {
    %c0_i32 = arith.constant 0 : i32
    return %arg0, %arg1, %arg2 : i32, i32, i32
  }
  func.func @transform_1(%arg0: i32, %arg1: i32, %arg2: i32) -> (i32, i32, i32) {
    %c0_i32 = arith.constant 0 : i32
    return %arg0, %arg1, %arg2 : i32, i32, i32
  }
  func.func @transform_2(%arg0: i32, %arg1: i32, %arg2: i32) -> (i32, i32, i32, i32) {
    %c0_i32 = arith.constant 0 : i32
    %c0_i32_0 = arith.constant 0 : i32
    return %arg0, %c0_i32, %arg1, %arg2 : i32, i32, i32, i32
  }
}

</mosaic_0001>

<bundles_post_ra>
// kernel: tpu_custom_call.1
= control target key start
LH: loop header
LB: loop body
LE: loop exit
PB: predicated region body
PF: predicated region fallthrough
CT: control target
= control target key end

     0   :  { %7 = vsyncpa [#allocation3], 0  ;;  %s893_s0 = inlined_call_operand.hbm [shape: f32[2,4,256], index: 0, kind: input, shape index: {}]   ;;  %s894_s1 = inlined_call_operand.hbm [shape: f32[2,4,256], index: 1, kind: input, shape index: {}]   ;;  %s895_s2 = inlined_call_operand.hbm [shape: f32[2,2,4,256], index: 2, kind: output, shape index: {}]  }
   0x1   :  { %9 = vsyncpa [#allocation3 + $0x1], 0 }
   0x2   :  { %10 = vsyncpa [#allocation6], 0 }
   0x3   :  { %12 = vsyncpa [#allocation6 + $0x1], 0 }
   0x4   :  { %13 = vsyncpa [#allocation4], 0 }
   0x5   :  { %15 = vsyncpa [#allocation4 + $0x1], 0  ;;  %s701_s9 = smov 0   ;;  %s703_s10 = smov 0  }
   0x6   :  { %s705_s11 = smov 0   ;;  %s707_s12 = smov 0  }
   0x7   :  { %s709_s13 = smov 0   ;;  %s711_s14 = smov 0  }
   0x8 LB: > { %s443_s15 = sadd.s32 4294967295, %s678_s14   ;;  %s444_s16 = sadd.s32 4294967294, %s678_s14   ;;  %s678_s14 = sphi %s711_s14, %s21_s14   ;;  %s674_s13 = sphi %s709_s13, %s911_s13   ;;  %s670_s12 = sphi %s707_s12, %s910_s12   ;;  %s666_s11 = sphi %s705_s11, %s909_s11   ;;  %s662_s10 = sphi %s703_s10, %s908_s10   ;;  %s658_s9 = sphi %s701_s9, %s907_s9  }
   0x9   : > { %s40_s17 = sadd.s32 1, %s674_s13  ;;  %s51_s18 = sadd.s32 1, %s666_s11 }
   0xa   : > { %p42_p0 = scmp.ge.s32.totalorder %s40_s17, 2  ;;  %p58_p1 = scmp.ne.s32.totalorder %s666_s11, %s662_s10 }
   0xb   : > { %p59_p2 = scmp.eq.s32.totalorder %s678_s14, 0  ;;  %p64_p3 = scmp.ne.s32.totalorder %s662_s10, %s658_s9 }
   0xc   : > { %s913_s17 = smov (%p42_p0, %s40_s17), 0  ;;  %p65_p5 = scmp.eq.s32.totalorder %s443_s15, 0 }
   0xd   : > { %p742_p4 = por %p59_p2, %p58_p1  ;;  %s44_s20 = ssub.s32 %s674_s13, %s913_s17 }
   0xe   : > { %p122_p6 = scmp.eq.s32.totalorder %s443_s15, 1  ;;  %p49_p7 = scmp.eq.s32.totalorder %s44_s20, 0 }
   0xf   : > { %p748_p8 = por %p65_p5, %p64_p3  ;;  %p128_p10 = scmp.eq.s32.totalorder %s444_s16, 1 }
  0x10   : > { %p752_p9 = por %p122_p6, %p58_p1  ;;  %p483_p13 = scmp.lt.s32.totalorder %s678_s14, 2 }
  0x11   : > { %s757_s23 = scalar_select %p49_p7, %s666_s11, %s51_s18  }
  0x12   : > { %p759_p11 = por %p128_p10, %p64_p3  ;;  %s766_s25 = sand.u32 1, %s666_s11  }
  0x13   : > { %s447_s26 = sshll.u32 %s766_s25, 3  ;;  %s463_s27 = sshll.u32 %s674_s13, 7 }
  0x14   : > { %s162_s30 = scalar_lea.hbm %s893_s0, %s463_s27  ;;  %s152_s3 = scalar_lea.vmem [#allocation2], %s447_s26 }
  0x15   : > { %s164_s4 = sshll.u32 %s152_s3, 4  ;;  %p775_p0 = pnand %p483_p13, %p742_p4  ;;  %s165_s4 = int_to_ptr.vmem [resolvable:$true] %s164_s4 }
  0x16   : > { %p453_p1 = scmp.ge.s32.totalorder %s678_s14, 1  ;;  %p192_p2 = scmp.lt.s32.totalorder %s678_s14, 3 }
  0x17   : > { %s149_s6 = scalar_lea.sflag [#allocation3], %s766_s25  ;;  %p540_p3 = pneg %p775_p0 }
  0x18   : > { %s551_s7 = scalar_lea.vmem %s165_s4, 128  ;;  %s680_s8 = smov [#allocation2]  }
  0x19   : > { %p552_p5 = scmp.ne.s32.totalorder %s165_s4, %s551_s7  ;;  %s556_s15 = sshll.u32 %s680_s8, 4  ;;  %s557_s15 = int_to_ptr.vmem [resolvable:$false] %s556_s15 }
  0x1a   : > { %s558_s16 = scalar_lea.vmem %s557_s15, 256  ;;  %p559_p4 = scmp.lt.s32.totalorder %s165_s4, %s557_s15 }
  0x1b   : > { %p554_p6 = pnand %p552_p5, %p540_p3  ;;  %p560_p10 = scmp.lt.s32.totalorder %s558_s16, %s551_s7 }
  0x1d   : > { %p555_p7 = pneg %p554_p6  ;;  %p561_p13 = por %p560_p10, %p559_p4 }
  0x1f   : > { %p562_p12 = pnand %p561_p13, %p555_p7 }
  0x21   : > { %565 = shalt.err (!%p562_p12)
}
  0x22   : > { %475 = dma.hbm_to_vmem [thread:$0]  (!%p775_p0), %s162_s30, 128, %s165_s4, %s149_s6  }
  0x23   : > { %p793_p5 = pnand %p453_p1, %p192_p2  ;;  %s185_s28 = scalar_lea.hbm %s894_s1, %s463_s27 }
  0x24   : > { %s175_s29 = scalar_lea.vmem [#allocation5], %s447_s26  ;;  %s172_s7 = scalar_lea.sflag [#allocation6], %s766_s25 }
  0x25   : > { %s187_s3 = sshll.u32 %s175_s29, 4  ;;  %s681_s30 = smov [#allocation5]   ;;  %s188_s3 = int_to_ptr.vmem [resolvable:$true] %s187_s3 }
  0x26   : > { %s579_s8 = scalar_lea.vmem %s188_s3, 128  ;;  %s584_s4 = sshll.u32 %s681_s30, 4  ;;  %s585_s4 = int_to_ptr.vmem [resolvable:$false] %s584_s4 }
  0x27   : > { %p580_p12 = scmp.ne.s32.totalorder %s188_s3, %s579_s8  ;;  %s586_s6 = scalar_lea.vmem %s585_s4, 256 }
  0x28   : > { %p587_p1 = scmp.lt.s32.totalorder %s188_s3, %s585_s4  ;;  %p588_p2 = scmp.lt.s32.totalorder %s586_s6, %s579_s8 }
  0x29   : > { %p582_p6 = pnand %p580_p12, %p540_p3 }
  0x2a   : > { %p589_p4 = por %p588_p2, %p587_p1 }
  0x2b   : > { %p583_p7 = pneg %p582_p6 }
  0x2d   : > { %p590_p10 = pnand %p589_p4, %p583_p7 }
  0x2f   : > { %593 = shalt.err (!%p590_p10)
}
  0x30   : > { %478 = dma.hbm_to_vmem [thread:$0]  (!%p775_p0), %s185_s28, 128, %s188_s3, %s172_s7  }
  0x31   : > { %196 = sbr.rel (%p793_p5) target bundleno = 195 (0xc3), region = 28  ;;  %s809_s25 = sand.u32 (!%p793_p5), 1, %s662_s10  }
  0x32   : > { %s454_s26 = sshll.u32 (!%p793_p5), %s809_s25, 3  ;;  %s199_s27 = scalar_lea.sflag (!%p793_p5), [#allocation3], %s809_s25 }
  0x33   : > { %s202_s15 = scalar_lea.vmem (!%p793_p5), [#allocation2], %s454_s26 }
  0x36   : > { %645 = dma.done.wait (%p748_p8), %s199_s27, 128  }
  0x37   : > { %647 = vsyncadd (%p748_p8), %s199_s27, 4294967168  ;;  %s208_s5 = scalar_lea.sflag [#allocation6], %s809_s25  ;;  %s211_s16 = scalar_lea.vmem [#allocation5], %s454_s26 }
  0x38   : > { %649 = dma.done.wait (%p748_p8), %s208_s5, 128  }
  0x39   : > { %651 = vsyncadd (%p748_p8), %s208_s5, 4294967168  ;;  %v242_v0 = vlaneseq  ;;  %v241_v6 = vld [vmem:[%s211_s16] sm:$0xff]  ;;  %s456_s18 = sshll.u32 %s809_s25, 4  ;;  %v240_v7 = vld [vmem:[%s202_s15] sm:$0xff]  ;;  %s682_s19 = smov 3  }
  0x3a   : > { %288 = vrot.lane.b32.xlu0 %v241_v6, %s682_s19  ;;  %v286_v8 = vcombine.high %v241_v6, %v241_v6  ;;  %v276_v10 = vcombine.high %v240_v7, %v240_v7  ;;  %s236_s21 = scalar_lea.vmem [#allocation7], %s456_s18  ;;  %s465_s28 = sshll.u32 %s670_s12, 8 }
  0x3b   : > { %v243_v1 = vand.u32 127, %v242_v0  ;;  %s321_s20 = sshll.u32 %s236_s21, 4  ;;  %s845_s7 = scalar_lea.hbm %s895_s2, %s465_s28  ;;  %s836_s20 = int_to_ptr.vmem [resolvable:$true] %s321_s20 }
  0x3c   : > { %s304_s12 = scalar_lea.sflag [#allocation4], %s809_s25  ;;  %s594_s8 = scalar_lea.vmem %s836_s20, 256 }
  0x3d   : > { %v244_v2 = vadd.s32 128, %v243_v1  ;;  %v249_v3 = vand.u32 15, %v243_v1  ;;  %vm292_vm2 = vcmp.lt.s32.totalorder %v243_v1, 3  ;;  %p595_p8 = scmp.ne.s32.totalorder %s836_s20, %s594_s8  ;;  %s683_s30 = smov [#allocation7]  }
  0x3e   : > { %290 = vrot.lane.b32.xlu0 %v286_v8, %s682_s19  ;;  %s598_s4 = sshll.u32 %s683_s30, 4  ;;  %s599_s4 = int_to_ptr.vmem [resolvable:$false] %s598_s4 }
  0x3f   : > { %v256_v4 = vand.u32 15, %v244_v2  ;;  %vm822_vm0 = vcmp.ge.s32.totalorder %v249_v3, 3  ;;  %p596_p0 = pnand %p595_p8, %p752_p9  ;;  %s600_s6 = scalar_lea.vmem %s599_s4, 512 }
  0x40   : > { %v278_v11 = vsel %vm822_vm0, %v240_v7, 0.0  ;;  %p601_p13 = scmp.lt.s32.totalorder %s836_s20, %s599_s4  ;;  %p602_p5 = scmp.lt.s32.totalorder %s600_s6, %s594_s8 }
  0x41   : > { %vm827_vm1 = vcmp.ge.s32.totalorder %v256_v4, 3  ;;  %p597_p3 = pneg %p596_p0 }
  0x42   : > { %v279_v12 = vsel %vm827_vm1, %v276_v10, 0.0  ;;  %p603_p12 = por %p602_p5, %p601_p13 }
  0x43   : > { %v282_v13 = vcombine.low %v278_v11, %v279_v12 }
  0x44   : > { %p604_p6 = pnand %p603_p12, %p597_p3 }
  0x45   : > { %284 = vst [vmem:[%s236_s21] sm:$0xff] %v282_v13 }
  0xac   : > { %v289_v14 = vpop.permute.xlu0 %288 }
  0xb0   : > { %v291_v15 = vpop.permute.xlu0 %290 }
  0xb1   : > { %v293_v16 = vsel %vm292_vm2, %v289_v14, %v291_v15  ;;  %v294_v17 = vsel %vm292_vm2, %v291_v15, %v289_v14 }
  0xb2   : > { %v295_v18 = vsel %vm822_vm0, %v294_v17, 0.0  ;;  %v296_v19 = vsel %vm827_vm1, %v293_v16, 0.0 }
  0xb3   : > { %v299_v20 = vcombine.low %v295_v18, %v296_v19 }
  0xb5   : > { %457 = vst [vmem:[%s236_s21 + $0x8] sm:$0xff] %v299_v20 }
  0xb6   : > { %607 = shalt.err (!%p604_p6)
}
  0xb7   : > { %s608_s26 = scalar_lea.hbm %s845_s7, 256  ;;  %s612_s5 = scalar_lea.hbm %s895_s2, 512 }
  0xb8   : > { %p609_p7 = scmp.ne.s32.totalorder %s845_s7, %s608_s26  ;;  %p613_p4 = scmp.lt.s32.totalorder %s845_s7, %s895_s2 }
  0xb9   : > { %p614_p10 = scmp.lt.s32.totalorder %s612_s5, %s608_s26 }
  0xba   : > { %p610_p1 = pnand %p609_p7, %p752_p9 }
  0xbb   : > { %p615_p8 = por %p614_p10, %p613_p4 }
  0xbc   : > { %p611_p2 = pneg %p610_p1 }
  0xbe   : > { %p616_p0 = pnand %p615_p8, %p611_p2 }
  0xc0   : > { %619 = shalt.err (!%p616_p0)
}
  0xc1   : > { %s684_s19 = smov 128   ;;  %s685_s21 = smov 8  }
  0xc2   : > { %470 = dma.vmem_to_hbm [thread:$0]  (%p752_p9), %s836_s20, 256, %s845_s7, %s304_s12, %s684_s19, %s684_s19, %s685_s21  }
  0xc3 PF: > { %s336_s28 = sand.u32 1, %s658_s9   ;;  %p906_p3 = scmp.ge.s32.totalorder %s678_s14, 2 }
  0xc4   : > { %s337_s29 = scalar_lea.sflag [#allocation4], %s336_s28 }
  0xc5   : > { %p480_p13 = pnand %p906_p3, %p759_p11 }
  0xc7   : > { %p481_p5 = pneg %p480_p13 }
  0xc9   : > { %653 = dma.done.wait (%p481_p5), %s337_s29, 256  }
  0xca   : > { %655 = vsyncadd (%p481_p5), %s337_s29, 4294967040  ;;  %s21_s14 = sadd.s32 1, %s678_s14   ;;  %s907_s9 = smov %s662_s10 }
  0xcb   : > { %p18_p12 = scmp.ge.s32.totalorder %s21_s14, 4   ;;  %s908_s10 = smov %s666_s11 }
  0xcc   : > { %s909_s11 = smov %s757_s23  ;;  %s910_s12 = smov %s674_s13 }
  0xcd   : > { %s911_s13 = smov %s913_s17  ;;  %20 = sbr.rel (!%p18_p12) target bundleno = 8 (0x8), region = 87 }
  0xd2   :  { %342 = vsyncpa [#allocation3], 1 }
  0xd3   :  { %344 = vsyncpa [#allocation3 + $0x1], 1 }
  0xd4   :  { %345 = vsyncpa [#allocation6], 1 }
  0xd5   :  { %347 = vsyncpa [#allocation6 + $0x1], 1 }
  0xd6   :  { %348 = vsyncpa [#allocation4], 1 }
  0xd7   :  { %350 = vsyncpa [#allocation4 + $0x1], 1 }

</bundles_post_ra>
